<compile_context>
chip_gen: v5e
topology: v5e:2x2
jax: 0.10.0
libtpu: 0.0.40
codegen_flags: <defaults>
</compile_context>

<pallas_src>
import jax
import jax.numpy as jnp
from jax.experimental import pallas as pl
from jax.experimental.pallas import tpu as pltpu

_LANES = 128                       # vreg lane width — last dim of flattened layout
_MAX_TILE_BYTES = 4 * 1024 * 1024  # ~4 MiB per VMEM buffer per tile
_VMEM_LIMIT_BYTES = 32 * 1024 * 1024  # safe on v7x scoped VMEM; plenty on v5e/v6e


def _copy_kernel(x_ref, o_ref):
    # Pure lane-dense tile copy: full-width, unmasked vst per vreg.
    o_ref[...] = x_ref[...]


def _round_up(n: int, m: int) -> int:
    return ((n + m - 1) // m) * m


def _sublane_multiple(dtype) -> int:
    """Native sublane packing: 8 rows for 32-bit, 16 for 16-bit, 32 for 8-bit."""
    itemsize = jnp.dtype(dtype).itemsize
    return max(8, 32 // max(itemsize, 1))


def _pick_tile_rows(rows_raw: int, sub: int, itemsize: int) -> int:
    """Row-tile: multiple of `sub`, bytes-budgeted, and small enough to give the
    grid >= 2 steps on medium/large tensors (v7x megacore sharding)."""
    max_tile_rows = max(sub, (_MAX_TILE_BYTES // (_LANES * itemsize)) // sub * sub)
    rows = _round_up(rows_raw, sub)
    if rows <= 2 * sub:
        return rows  # tiny tensor: one small block is optimal
    # Prefer >= 2 grid steps so ("parallel",) can shard across both TCs on v7x.
    tile = min(max_tile_rows, _round_up(pl.cdiv(rows, 2), sub))
    return tile


def _identity_pallas(x):
    """Lane-dense, tiled, software-pipelined identity copy via a Pallas kernel."""
    orig_shape = x.shape
    total = x.size
    itemsize = jnp.dtype(x.dtype).itemsize
    sub = _sublane_multiple(x.dtype)

    rows_raw = pl.cdiv(total, _LANES)
    tile_rows = _pick_tile_rows(rows_raw, sub, itemsize)
    rows = _round_up(rows_raw, tile_rows)      # padded row count: tile divides it
    grid = (rows // tile_rows,)

    padded_total = rows * _LANES
    flat = x.reshape(-1)
    if padded_total > total:
        flat = jnp.pad(flat, (0, padded_total - total))
    x2 = flat.reshape(rows, _LANES)

    y2 = pl.pallas_call(
        _copy_kernel,
        out_shape=jax.ShapeDtypeStruct((rows, _LANES), x.dtype),
        grid=grid,
        in_specs=[pl.BlockSpec((tile_rows, _LANES), lambda i: (i, 0))],
        out_specs=pl.BlockSpec((tile_rows, _LANES), lambda i: (i, 0)),
        compiler_params=pltpu.CompilerParams(
            dimension_semantics=("parallel",),
            vmem_limit_bytes=_VMEM_LIMIT_BYTES,
        ),
    )(x2)

    return y2.reshape(-1)[:total].reshape(orig_shape)


def dqn_forward(x):
    """Semantics-exact port of DQN.forward: the body is `pass` -> returns None.

    No kernel is launched: the reference forward performs no computation and
    has no observable result, so any kernel here would be pure dead work.
    """
    # TODO(synk): reference forward is `pass` (no parameters, no compute,
    # returns None); there is nothing to translate to a Pallas kernel here.
    del x
    return None


if __name__ == "__main__":
    key = jax.random.PRNGKey(0)
    k1, k2 = jax.random.split(key)

    # Small NCHW input consistent with a typical DQN image input (f32,
    # size divisible by 128 -> no padding path).
    x = jax.random.normal(k1, (2, 4, 16, 16), dtype=jnp.float32)
    y = _identity_pallas(x)
    jax.block_until_ready(y)
    assert y.shape == x.shape and y.dtype == x.dtype
    assert bool(jnp.allclose(y, x))

    # Ragged-size bf16 input: exercises the pad-to-tile-multiple path and the
    # dtype-aware (16, 128) sublane alignment.
    xr = jax.random.normal(k2, (3, 5, 7, 11), dtype=jnp.bfloat16)
    yr = _identity_pallas(xr)
    jax.block_until_ready(yr)
    assert yr.shape == xr.shape and yr.dtype == xr.dtype
    assert bool(jnp.array_equal(yr, xr))

    # Module-equivalent call: returns None, exactly like the PyTorch forward,
    # and launches no kernel (dead work removed).
    out = dqn_forward(x)
    assert out is None

    print("KERNEL_OK")
</pallas_src>

<mosaic_0001>
module attributes {stable_mosaic.version = 11 : i64} {
  func.func @_copy_kernel(%arg0: i32, %arg1: memref<16x128xf32, #tpu.memory_space<vmem>>, %arg2: memref<16x128xf32, #tpu.memory_space<vmem>>) attributes {dimension_semantics = [#tpu.dimension_semantics<parallel>], iteration_bounds = array<i64: 1>, scalar_prefetch = 0 : i64, scratch_operands = 0 : i64, tpu.core_type = #tpu.core_type<tc>, window_params = [{transform_indices = @transform_0, window_bounds = array<i64: 16, 128>}, {transform_indices = @transform_1, window_bounds = array<i64: 16, 128>}]} {
    %c0 = arith.constant 0 : index
    %c0_0 = arith.constant 0 : index
    %0 = vector.load %arg1[%c0, %c0_0] : memref<16x128xf32, #tpu.memory_space<vmem>>, vector<16x128xf32>
    %c0_1 = arith.constant 0 : index
    %c0_2 = arith.constant 0 : index
    %1 = vector.load %arg2[%c0_1, %c0_2] : memref<16x128xf32, #tpu.memory_space<vmem>>, vector<16x128xf32>
    tpu.vector_store %arg2[%c0_1, %c0_2], %0 {strides = array<i32>} : memref<16x128xf32, #tpu.memory_space<vmem>>, vector<16x128xf32>,
    return
  }
  func.func @transform_0(%arg0: i32) -> (i32, i32) {
    %c0_i32 = arith.constant 0 : i32
    %c0_i32_0 = arith.constant 0 : i32
    return %arg0, %c0_i32 : i32, i32
  }
  func.func @transform_1(%arg0: i32) -> (i32, i32) {
    %c0_i32 = arith.constant 0 : i32
    %c0_i32_0 = arith.constant 0 : i32
    return %arg0, %c0_i32 : i32, i32
  }
}

</mosaic_0001>

<bundles_post_ra>
// kernel: tpu_custom_call.1
= control target key start
LH: loop header
LB: loop body
LE: loop exit
PB: predicated region body
PF: predicated region fallthrough
CT: control target
= control target key end

     0   :  { %6 = vsyncpa [#allocation3], 0  ;;  %s124_s0 = inlined_call_operand.hbm [shape: f32[16,128], index: 0, kind: input, shape index: {}]   ;;  %s125_s1 = inlined_call_operand.hbm [shape: f32[16,128], index: 1, kind: output, shape index: {}]  }
   0x1   :  { %7 = vsyncpa [#allocation4], 0  ;;  %s12_s8 = sshll.u32 %s124_s0, 4  ;;  %s104_s9 = smov [#allocation2]   ;;  %s13_s8 = int_to_ptr.hbm [resolvable:$true] %s12_s8 }
   0x2   :  { %s14_s10 = sshll.u32 %s104_s9, 4  ;;  %s105_s11 = smov 128   ;;  %s15_s10 = int_to_ptr.vmem [resolvable:$true] %s14_s10 }
   0x3   :  { %s106_s12 = smov 8  }
   0x4   :  { %20 = dma.hbm_to_vmem [thread:$0]  %s13_s8, 256, %s15_s10, [#allocation3], %s105_s11, %s105_s11, %s106_s12  }
   0x5   :  { %100 = dma.done.wait [#allocation3], 256  }
   0x6   :  { %101 = vsyncadd [#allocation3], 4294967040  ;;  %s107_s13 = smov [#allocation5]   ;;  %s35_s17 = sshll.u32 %s125_s1, 4  ;;  %v25_v0 = vld [vmem:[#allocation2] sm:$0xff]  ;;  %v26_v1 = vld [vmem:[#allocation2 + $0x8] sm:$0xff]  ;;  %s36_s17 = int_to_ptr.hbm [resolvable:$true] %s35_s17 }
   0x7   :  { %s33_s14 = sshll.u32 %s107_s13, 4  ;;  %27 = vst [vmem:[#allocation5] sm:$0xff] %v25_v0  ;;  %s34_s14 = int_to_ptr.vmem [resolvable:$true] %s33_s14 }
   0x8   :  { %28 = vst [vmem:[#allocation5 + $0x8] sm:$0xff] %v26_v1 }
   0x9   :  { %41 = dma.vmem_to_hbm [thread:$0]  %s34_s14, 256, %s36_s17, [#allocation4], %s105_s11, %s105_s11, %s106_s12  }
   0xa   :  { %102 = dma.done.wait [#allocation4], 256  }
   0xb   :  { %103 = vsyncadd [#allocation4], 4294967040 }
   0xc   :  { %46 = vsyncpa [#allocation3], 1 }
   0xd   :  { %47 = vsyncpa [#allocation4], 1 }

</bundles_post_ra>
